<compile_context>
chip_gen: v5e
topology: v5e:2x2
jax: 0.10.0
libtpu: 0.0.40
codegen_flags: <defaults>
</compile_context>

<pallas_src>
import jax
import jax.numpy as jnp
from jax.experimental import pallas as pl
from jax.experimental.pallas import tpu as pltpu

LANE = 128       # lane width (last dim)
SUBLANE = 8      # sublane width (second-to-last dim)
MIB = 1024 * 1024


def _round_up(x, m):
    return ((x + m - 1) // m) * m


def _vmem_capacity_bytes():
    """Physical VMEM per TensorCore; conservative fallback if query fails."""
    try:
        return int(pltpu.get_tpu_info().vmem_capacity_bytes)
    except Exception:          # no device / older API -> assume smallest (v7x)
        return 64 * MIB


def mlp_kernel(x_ref,
               w1_ref, b1_ref,
               w2_ref, b2_ref,
               w3_ref, b3_ref,
               w4_ref, b4_ref,
               w5_ref, b5_ref,
               o_ref):
    # bf16 operands -> f32 MXU accumulator -> f32 bias+ReLU epilogue -> bf16.
    h = jnp.dot(x_ref[...], w1_ref[...], preferred_element_type=jnp.float32)
    h = jnp.maximum(h + b1_ref[...], 0.0).astype(jnp.bfloat16)
    h = jnp.dot(h, w2_ref[...], preferred_element_type=jnp.float32)
    h = jnp.maximum(h + b2_ref[...], 0.0).astype(jnp.bfloat16)
    h = jnp.dot(h, w3_ref[...], preferred_element_type=jnp.float32)
    h = jnp.maximum(h + b3_ref[...], 0.0).astype(jnp.bfloat16)
    h = jnp.dot(h, w4_ref[...], preferred_element_type=jnp.float32)
    h = jnp.maximum(h + b4_ref[...], 0.0).astype(jnp.bfloat16)
    out = jnp.dot(h, w5_ref[...], preferred_element_type=jnp.float32)
    o_ref[...] = (out + b5_ref[...]).astype(o_ref.dtype)


def prepare_params(params):
    """One-time padding + bf16 cast of weights/biases (hoisted out of the
    per-call forward path). `params` is a list of (w [in,out], b [out])."""
    in_dim = params[0][0].shape[0]
    num_classes = params[-1][0].shape[1]
    true_dims = [(w.shape[0], w.shape[1]) for w, _ in params]

    # Lane-dense padding: every feature dim -> multiple of 128.
    # (For true dims >= 256 on v6e/v7x, 256-granularity padding would fill the
    #  2x256 MXU; irrelevant at hidden_size=32, so kept at 128 here.)
    in_pad = _round_up(in_dim, LANE)
    out_pads = [_round_up(n, LANE) for _, n in true_dims]
    k_pads = [in_pad] + out_pads[:-1]

    padded = []
    for (w, b), kp, npd in zip(params, k_pads, out_pads):
        k, n = w.shape
        w_p = jnp.zeros((kp, npd), jnp.bfloat16).at[:k, :n].set(
            w.astype(jnp.bfloat16))
        b_p = jnp.zeros((1, npd), jnp.float32).at[0, :n].set(
            b.astype(jnp.float32))
        padded.append((w_p, b_p))

    return {
        "in_dim": in_dim,
        "num_classes": num_classes,
        "true_dims": true_dims,
        "in_pad": in_pad,
        "k_pads": k_pads,
        "out_pads": out_pads,
        "padded": padded,
    }


def simple_nn_forward(x, prepared, *, out_dtype=jnp.float32,
                      max_tile_rows=None):
    """x: [..., input_size] float32. Returns [..., num_classes] `out_dtype`."""
    in_dim = prepared["in_dim"]
    num_classes = prepared["num_classes"]
    in_pad = prepared["in_pad"]
    k_pads = prepared["k_pads"]
    out_pads = prepared["out_pads"]
    out_pad = out_pads[-1]

    # Flatten any leading dims into the batch axis (fills the MXU M dim).
    lead_shape = x.shape[:-1]
    x2 = x.reshape(-1, x.shape[-1])
    B = x2.shape[0]

    # ---- generation-aware tiling / VMEM budget -----------------------------
    vmem_cap = _vmem_capacity_bytes()
    if max_tile_rows is None:
        # Bigger batch tiles on 128-MiB-VMEM parts (v5e/v6e); smaller on v7x.
        max_tile_rows = 1024 if vmem_cap > 96 * MIB else 512
    tb_cap = _round_up(max_tile_rows, SUBLANE)
    # Aim for >= 2 grid steps whenever the batch allows it so both v7x
    # TensorCores get work via the "parallel" batch axis; harmless elsewhere.
    tb = min(tb_cap, max(SUBLANE, _round_up(-(-B // 2), SUBLANE)))
    b_pad = _round_up(max(B, 1), tb)
    grid = (b_pad // tb,)

    out_itemsize = jnp.dtype(out_dtype).itemsize

    # Resident footprint: single-buffered weights/biases + double-buffered
    # x / out tiles + a generous allowance for the f32 intermediates.
    weight_bytes = sum(int(w.size) * w.dtype.itemsize +
                       int(b.size) * b.dtype.itemsize
                       for w, b in prepared["padded"])
    stream_bytes = 2 * tb * in_pad * 2 + 2 * tb * out_pad * out_itemsize
    interm_bytes = 4 * tb * max(out_pads) * (4 + 2)
    needed = weight_bytes + stream_bytes + interm_bytes
    vmem_limit = int(min(max(2 * needed, 32 * MIB), 0.75 * vmem_cap))

    # ---- pad x (the only per-call padding left) ----------------------------
    x_p = jnp.zeros((b_pad, in_pad), jnp.bfloat16).at[:B, :in_dim].set(
        x2.astype(jnp.bfloat16))

    flat_args = [x_p]
    in_specs = [pl.BlockSpec((tb, in_pad), lambda i: (i, 0))]
    for (w_p, b_p), kp, npd in zip(prepared["padded"], k_pads, out_pads):
        flat_args += [w_p, b_p]
        # Constant index map -> never re-fetched -> single pipeline buffer.
        in_specs += [
            pl.BlockSpec((kp, npd), lambda i: (0, 0),
                         pipeline_mode=pl.Buffered(1)),
            pl.BlockSpec((1, npd), lambda i: (0, 0),
                         pipeline_mode=pl.Buffered(1)),
        ]

    out_specs = pl.BlockSpec((tb, out_pad), lambda i: (i, 0))

    # Cost estimate from the *true* (unpadded) problem size.
    true_dims = prepared["true_dims"]
    flops = 2 * B * sum(k * n for k, n in true_dims)
    bytes_accessed = (B * in_dim * 2
                      + sum(k * n * 2 + n * 4 for k, n in true_dims)
                      + B * num_classes * out_itemsize)
    cost = pl.CostEstimate(flops=flops, transcendentals=0,
                           bytes_accessed=bytes_accessed)

    out_padded = pl.pallas_call(
        mlp_kernel,
        out_shape=jax.ShapeDtypeStruct((b_pad, out_pad), out_dtype),
        grid=grid,
        in_specs=in_specs,
        out_specs=out_specs,
        compiler_params=pltpu.CompilerParams(
            dimension_semantics=("parallel",),
            vmem_limit_bytes=vmem_limit,
        ),
        cost_estimate=cost,
    )(*flat_args)

    out = out_padded[:B, :num_classes]
    return out.reshape(*lead_shape, num_classes)


def init_linear(key, fan_in, fan_out):
    # Deterministic PyTorch-style uniform(-1/sqrt(fan_in), 1/sqrt(fan_in)).
    kw, kb = jax.random.split(key)
    bound = 1.0 / jnp.sqrt(fan_in)
    w = jax.random.uniform(kw, (fan_in, fan_out), jnp.float32, -bound, bound)
    b = jax.random.uniform(kb, (fan_out,), jnp.float32, -bound, bound)
    return w, b


if __name__ == "__main__":
    input_size = 32
    hidden_size = 32
    num_classes = 2
    batch = 8

    root = jax.random.PRNGKey(0)
    keys = jax.random.split(root, 6)

    params = [
        init_linear(keys[0], input_size, hidden_size),   # fc1
        init_linear(keys[1], hidden_size, hidden_size),  # fc2
        init_linear(keys[2], hidden_size, hidden_size),  # fc3
        init_linear(keys[3], hidden_size, hidden_size),  # fc4
        init_linear(keys[4], hidden_size, num_classes),  # fc5
    ]
    prepared = prepare_params(params)   # one-time pad + cast (hoisted)

    x = jax.random.normal(keys[5], (batch, input_size), jnp.float32)

    out = simple_nn_forward(x, prepared)
    jax.block_until_ready(out)

    # Reference in plain JAX with the same bf16-operand / f32-accumulate math.
    # TODO(synk): bf16 operands deviate slightly from a pure-f32 PyTorch
    # forward; expected rel. error ~1e-2 vs f32 if bit-exactness is required.
    h_ref = x
    for i, (w, b) in enumerate(params):
        h_ref = jnp.dot(h_ref.astype(jnp.bfloat16), w.astype(jnp.bfloat16),
                        preferred_element_type=jnp.float32) + b
        if i < len(params) - 1:
            h_ref = jnp.maximum(h_ref, 0.0)

    assert out.shape == (batch, num_classes)
    assert jnp.allclose(out, h_ref, atol=1e-2, rtol=1e-2), (
        float(jnp.max(jnp.abs(out - h_ref))))

    print("KERNEL_OK")
</pallas_src>

<mosaic_0001>
module attributes {stable_mosaic.version = 11 : i64} {
  func.func @mlp_kernel(%arg0: i32, %arg1: memref<8x128xbf16, #tpu.memory_space<vmem>>, %arg2: memref<128x128xbf16, #tpu.memory_space<vmem>>, %arg3: memref<1x128xf32, #tpu.memory_space<vmem>>, %arg4: memref<128x128xbf16, #tpu.memory_space<vmem>>, %arg5: memref<1x128xf32, #tpu.memory_space<vmem>>, %arg6: memref<128x128xbf16, #tpu.memory_space<vmem>>, %arg7: memref<1x128xf32, #tpu.memory_space<vmem>>, %arg8: memref<128x128xbf16, #tpu.memory_space<vmem>>, %arg9: memref<1x128xf32, #tpu.memory_space<vmem>>, %arg10: memref<128x128xbf16, #tpu.memory_space<vmem>>, %arg11: memref<1x128xf32, #tpu.memory_space<vmem>>, %arg12: memref<8x128xf32, #tpu.memory_space<vmem>>) attributes {dimension_semantics = [#tpu.dimension_semantics<parallel>], iteration_bounds = array<i64: 1>, scalar_prefetch = 0 : i64, scratch_operands = 0 : i64, tpu.core_type = #tpu.core_type<tc>, window_params = [{transform_indices = @transform_0, window_bounds = array<i64: 8, 128>}, {pipeline_mode = #tpu.pipeline_mode<synchronous>, transform_indices = @transform_1, window_bounds = array<i64: 128, 128>}, {pipeline_mode = #tpu.pipeline_mode<synchronous>, transform_indices = @transform_2, window_bounds = array<i64: 1, 128>}, {pipeline_mode = #tpu.pipeline_mode<synchronous>, transform_indices = @transform_3, window_bounds = array<i64: 128, 128>}, {pipeline_mode = #tpu.pipeline_mode<synchronous>, transform_indices = @transform_4, window_bounds = array<i64: 1, 128>}, {pipeline_mode = #tpu.pipeline_mode<synchronous>, transform_indices = @transform_5, window_bounds = array<i64: 128, 128>}, {pipeline_mode = #tpu.pipeline_mode<synchronous>, transform_indices = @transform_6, window_bounds = array<i64: 1, 128>}, {pipeline_mode = #tpu.pipeline_mode<synchronous>, transform_indices = @transform_7, window_bounds = array<i64: 128, 128>}, {pipeline_mode = #tpu.pipeline_mode<synchronous>, transform_indices = @transform_8, window_bounds = array<i64: 1, 128>}, {pipeline_mode = #tpu.pipeline_mode<synchronous>, transform_indices = @transform_9, window_bounds = array<i64: 128, 128>}, {pipeline_mode = #tpu.pipeline_mode<synchronous>, transform_indices = @transform_10, window_bounds = array<i64: 1, 128>}, {transform_indices = @transform_11, window_bounds = array<i64: 8, 128>}]} {
    %c0 = arith.constant 0 : index
    %c0_0 = arith.constant 0 : index
    %0 = vector.load %arg1[%c0, %c0_0] : memref<8x128xbf16, #tpu.memory_space<vmem>>, vector<8x128xbf16>
    %c0_1 = arith.constant 0 : index
    %c0_2 = arith.constant 0 : index
    %1 = vector.load %arg2[%c0_1, %c0_2] : memref<128x128xbf16, #tpu.memory_space<vmem>>, vector<128x128xbf16>
    %cst = arith.constant dense<0.000000e+00> : vector<8x128xf32>
    %2 = tpu.matmul %0, %1, %cst {dimension_numbers = #tpu.dot_dimension_numbers<[1], [0], [0], [1], [0, 0, 1, 1], [], []>} : vector<8x128xbf16>, vector<128x128xbf16>, vector<8x128xf32> -> vector<8x128xf32>
    %c0_3 = arith.constant 0 : index
    %c0_4 = arith.constant 0 : index
    %3 = vector.load %arg3[%c0_3, %c0_4] : memref<1x128xf32, #tpu.memory_space<vmem>>, vector<1x128xf32>
    %4 = vector.broadcast %3 : vector<1x128xf32> to vector<8x128xf32>
    %5 = arith.addf %2, %4 : vector<8x128xf32>
    %cst_5 = arith.constant 0.000000e+00 : f32
    %6 = vector.broadcast %cst_5 : f32 to vector<8x128xf32>
    %7 = arith.maximumf %5, %6 : vector<8x128xf32>
    %8 = arith.truncf %7 : vector<8x128xf32> to vector<8x128xbf16>
    %c0_6 = arith.constant 0 : index
    %c0_7 = arith.constant 0 : index
    %9 = vector.load %arg4[%c0_6, %c0_7] : memref<128x128xbf16, #tpu.memory_space<vmem>>, vector<128x128xbf16>
    %cst_8 = arith.constant dense<0.000000e+00> : vector<8x128xf32>
    %10 = tpu.matmul %8, %9, %cst_8 {dimension_numbers = #tpu.dot_dimension_numbers<[1], [0], [0], [1], [0, 0, 1, 1], [], []>} : vector<8x128xbf16>, vector<128x128xbf16>, vector<8x128xf32> -> vector<8x128xf32>
    %c0_9 = arith.constant 0 : index
    %c0_10 = arith.constant 0 : index
    %11 = vector.load %arg5[%c0_9, %c0_10] : memref<1x128xf32, #tpu.memory_space<vmem>>, vector<1x128xf32>
    %12 = vector.broadcast %11 : vector<1x128xf32> to vector<8x128xf32>
    %13 = arith.addf %10, %12 : vector<8x128xf32>
    %cst_11 = arith.constant 0.000000e+00 : f32
    %14 = vector.broadcast %cst_11 : f32 to vector<8x128xf32>
    %15 = arith.maximumf %13, %14 : vector<8x128xf32>
    %16 = arith.truncf %15 : vector<8x128xf32> to vector<8x128xbf16>
    %c0_12 = arith.constant 0 : index
    %c0_13 = arith.constant 0 : index
    %17 = vector.load %arg6[%c0_12, %c0_13] : memref<128x128xbf16, #tpu.memory_space<vmem>>, vector<128x128xbf16>
    %cst_14 = arith.constant dense<0.000000e+00> : vector<8x128xf32>
    %18 = tpu.matmul %16, %17, %cst_14 {dimension_numbers = #tpu.dot_dimension_numbers<[1], [0], [0], [1], [0, 0, 1, 1], [], []>} : vector<8x128xbf16>, vector<128x128xbf16>, vector<8x128xf32> -> vector<8x128xf32>
    %c0_15 = arith.constant 0 : index
    %c0_16 = arith.constant 0 : index
    %19 = vector.load %arg7[%c0_15, %c0_16] : memref<1x128xf32, #tpu.memory_space<vmem>>, vector<1x128xf32>
    %20 = vector.broadcast %19 : vector<1x128xf32> to vector<8x128xf32>
    %21 = arith.addf %18, %20 : vector<8x128xf32>
    %cst_17 = arith.constant 0.000000e+00 : f32
    %22 = vector.broadcast %cst_17 : f32 to vector<8x128xf32>
    %23 = arith.maximumf %21, %22 : vector<8x128xf32>
    %24 = arith.truncf %23 : vector<8x128xf32> to vector<8x128xbf16>
    %c0_18 = arith.constant 0 : index
    %c0_19 = arith.constant 0 : index
    %25 = vector.load %arg8[%c0_18, %c0_19] : memref<128x128xbf16, #tpu.memory_space<vmem>>, vector<128x128xbf16>
    %cst_20 = arith.constant dense<0.000000e+00> : vector<8x128xf32>
    %26 = tpu.matmul %24, %25, %cst_20 {dimension_numbers = #tpu.dot_dimension_numbers<[1], [0], [0], [1], [0, 0, 1, 1], [], []>} : vector<8x128xbf16>, vector<128x128xbf16>, vector<8x128xf32> -> vector<8x128xf32>
    %c0_21 = arith.constant 0 : index
    %c0_22 = arith.constant 0 : index
    %27 = vector.load %arg9[%c0_21, %c0_22] : memref<1x128xf32, #tpu.memory_space<vmem>>, vector<1x128xf32>
    %28 = vector.broadcast %27 : vector<1x128xf32> to vector<8x128xf32>
    %29 = arith.addf %26, %28 : vector<8x128xf32>
    %cst_23 = arith.constant 0.000000e+00 : f32
    %30 = vector.broadcast %cst_23 : f32 to vector<8x128xf32>
    %31 = arith.maximumf %29, %30 : vector<8x128xf32>
    %32 = arith.truncf %31 : vector<8x128xf32> to vector<8x128xbf16>
    %c0_24 = arith.constant 0 : index
    %c0_25 = arith.constant 0 : index
    %33 = vector.load %arg10[%c0_24, %c0_25] : memref<128x128xbf16, #tpu.memory_space<vmem>>, vector<128x128xbf16>
    %cst_26 = arith.constant dense<0.000000e+00> : vector<8x128xf32>
    %34 = tpu.matmul %32, %33, %cst_26 {dimension_numbers = #tpu.dot_dimension_numbers<[1], [0], [0], [1], [0, 0, 1, 1], [], []>} : vector<8x128xbf16>, vector<128x128xbf16>, vector<8x128xf32> -> vector<8x128xf32>
    %c0_27 = arith.constant 0 : index
    %c0_28 = arith.constant 0 : index
    %35 = vector.load %arg11[%c0_27, %c0_28] : memref<1x128xf32, #tpu.memory_space<vmem>>, vector<1x128xf32>
    %36 = vector.broadcast %35 : vector<1x128xf32> to vector<8x128xf32>
    %37 = arith.addf %34, %36 : vector<8x128xf32>
    %c0_29 = arith.constant 0 : index
    %c0_30 = arith.constant 0 : index
    %38 = vector.load %arg12[%c0_29, %c0_30] : memref<8x128xf32, #tpu.memory_space<vmem>>, vector<8x128xf32>
    tpu.vector_store %arg12[%c0_29, %c0_30], %37 {strides = array<i32>} : memref<8x128xf32, #tpu.memory_space<vmem>>, vector<8x128xf32>,
    return
  }
  func.func @transform_0(%arg0: i32) -> (i32, i32) {
    %c0_i32 = arith.constant 0 : i32
    %c0_i32_0 = arith.constant 0 : i32
    return %arg0, %c0_i32 : i32, i32
  }
  func.func @transform_1(%arg0: i32) -> (i32, i32) {
    %c0_i32 = arith.constant 0 : i32
    %c0_i32_0 = arith.constant 0 : i32
    %c0_i32_1 = arith.constant 0 : i32
    return %c0_i32, %c0_i32_0 : i32, i32
  }
  func.func @transform_2(%arg0: i32) -> (i32, i32) {
    %c0_i32 = arith.constant 0 : i32
    %c0_i32_0 = arith.constant 0 : i32
    %c0_i32_1 = arith.constant 0 : i32
    return %c0_i32, %c0_i32_0 : i32, i32
  }
  func.func @transform_3(%arg0: i32) -> (i32, i32) {
    %c0_i32 = arith.constant 0 : i32
    %c0_i32_0 = arith.constant 0 : i32
    %c0_i32_1 = arith.constant 0 : i32
    return %c0_i32, %c0_i32_0 : i32, i32
  }
  func.func @transform_4(%arg0: i32) -> (i32, i32) {
    %c0_i32 = arith.constant 0 : i32
    %c0_i32_0 = arith.constant 0 : i32
    %c0_i32_1 = arith.constant 0 : i32
    return %c0_i32, %c0_i32_0 : i32, i32
  }
  func.func @transform_5(%arg0: i32) -> (i32, i32) {
    %c0_i32 = arith.constant 0 : i32
    %c0_i32_0 = arith.constant 0 : i32
    %c0_i32_1 = arith.constant 0 : i32
    return %c0_i32, %c0_i32_0 : i32, i32
  }
  func.func @transform_6(%arg0: i32) -> (i32, i32) {
    %c0_i32 = arith.constant 0 : i32
    %c0_i32_0 = arith.constant 0 : i32
    %c0_i32_1 = arith.constant 0 : i32
    return %c0_i32, %c0_i32_0 : i32, i32
  }
  func.func @transform_7(%arg0: i32) -> (i32, i32) {
    %c0_i32 = arith.constant 0 : i32
    %c0_i32_0 = arith.constant 0 : i32
    %c0_i32_1 = arith.constant 0 : i32
    return %c0_i32, %c0_i32_0 : i32, i32
  }
  func.func @transform_8(%arg0: i32) -> (i32, i32) {
    %c0_i32 = arith.constant 0 : i32
    %c0_i32_0 = arith.constant 0 : i32
    %c0_i32_1 = arith.constant 0 : i32
    return %c0_i32, %c0_i32_0 : i32, i32
  }
  func.func @transform_9(%arg0: i32) -> (i32, i32) {
    %c0_i32 = arith.constant 0 : i32
    %c0_i32_0 = arith.constant 0 : i32
    %c0_i32_1 = arith.constant 0 : i32
    return %c0_i32, %c0_i32_0 : i32, i32
  }
  func.func @transform_10(%arg0: i32) -> (i32, i32) {
    %c0_i32 = arith.constant 0 : i32
    %c0_i32_0 = arith.constant 0 : i32
    %c0_i32_1 = arith.constant 0 : i32
    return %c0_i32, %c0_i32_0 : i32, i32
  }
  func.func @transform_11(%arg0: i32) -> (i32, i32) {
    %c0_i32 = arith.constant 0 : i32
    %c0_i32_0 = arith.constant 0 : i32
    return %arg0, %c0_i32 : i32, i32
  }
}

</mosaic_0001>

<bundles_post_ra>
// kernel: tpu_custom_call.1
= control target key start
LH: loop header
LB: loop body
LE: loop exit
PB: predicated region body
PF: predicated region fallthrough
CT: control target
= control target key end

     0   :  { %16 = vsyncpa [#allocation3], 0  ;;  %s1078_s0 = inlined_call_operand.hbm [shape: bf16[8,128], index: 0, kind: input, shape index: {}]   ;;  %s1079_s1 = inlined_call_operand.hbm [shape: bf16[128,128], index: 1, kind: input, shape index: {}]   ;;  %s1080_s2 = inlined_call_operand.vmem [shape: f32[1,128], index: 2, kind: input, shape index: {}]   ;;  %s1081_s3 = inlined_call_operand.hbm [shape: bf16[128,128], index: 3, kind: input, shape index: {}]   ;;  %s1082_s4 = inlined_call_operand.vmem [shape: f32[1,128], index: 4, kind: input, shape index: {}]   ;;  %s1083_s5 = inlined_call_operand.hbm [shape: bf16[128,128], index: 5, kind: input, shape index: {}]   ;;  %s1084_s6 = inlined_call_operand.vmem [shape: f32[1,128], index: 6, kind: input, shape index: {}]   ;;  %s1085_s7 = inlined_call_operand.hbm [shape: bf16[128,128], index: 7, kind: input, shape index: {}]   ;;  %s1086_s8 = inlined_call_operand.vmem [shape: f32[1,128], index: 8, kind: input, shape index: {}]   ;;  %s1087_s9 = inlined_call_operand.hbm [shape: bf16[128,128], index: 9, kind: input, shape index: {}]   ;;  %s1088_s10 = inlined_call_operand.vmem [shape: f32[1,128], index: 10, kind: input, shape index: {}]   ;;  %s1089_s11 = inlined_call_operand.hbm [shape: f32[8,128], index: 11, kind: output, shape index: {}]  }
   0x1   :  { %17 = vsyncpa [#allocation6], 0 }
   0x2   :  { %18 = vsyncpa [#allocation9], 0 }
   0x3   :  { %19 = vsyncpa [#allocation12], 0  ;;  %s36_s19 = sshll.u32 %s1079_s1, 4  ;;  %s37_s19 = int_to_ptr.hbm [resolvable:$true] %s36_s19 }
   0x4   :  { %20 = vsyncpa [#allocation4], 0  ;;  %s958_s20 = smov [#allocation5]   ;;  %s66_s24 = sshll.u32 %s1083_s5, 4  ;;  %s67_s24 = int_to_ptr.hbm [resolvable:$true] %s66_s24 }
   0x5   :  { %s38_s21 = sshll.u32 %s958_s20, 4  ;;  %s959_s25 = smov 64   ;;  %s39_s21 = int_to_ptr.vmem [resolvable:$true] %s38_s21 }
   0x6   :  { %s960_s26 = smov 4   ;;  %s961_s27 = smov [#allocation8]  }
   0x7   :  { %44 = dma.hbm_to_vmem [thread:$0]  %s37_s19, 1024, %s39_s21, [#allocation6], %s959_s25, %s959_s25, %s960_s26  }
   0x8   :  { %s68_s28 = sshll.u32 %s961_s27, 4  ;;  %s26_s30 = sshll.u32 %s1078_s0, 4  ;;  %s69_s28 = int_to_ptr.vmem [resolvable:$true] %s68_s28  ;;  %s27_s30 = int_to_ptr.hbm [resolvable:$true] %s26_s30 }
   0x9   :  { %74 = dma.hbm_to_vmem [thread:$0]  %s67_s24, 1024, %s69_s28, [#allocation9], %s959_s25, %s959_s25, %s960_s26  }
   0xa   :  { %s51_s13 = sshll.u32 %s1081_s3, 4  ;;  %s962_s14 = smov [#allocation2]   ;;  %s52_s13 = int_to_ptr.hbm [resolvable:$true] %s51_s13 }
   0xb   :  { %s28_s15 = sshll.u32 %s962_s14, 4  ;;  %s963_s16 = smov [#allocation7]   ;;  %s29_s15 = int_to_ptr.vmem [resolvable:$true] %s28_s15 }
   0xc   :  { %31 = dma.hbm_to_vmem [thread:$0]  %s27_s30, 64, %s29_s15, [#allocation3]  }
   0xd   :  { %s53_s17 = sshll.u32 %s963_s16, 4  ;;  %s81_s0 = sshll.u32 %s1085_s7, 4  ;;  %s54_s17 = int_to_ptr.vmem [resolvable:$true] %s53_s17  ;;  %s82_s0 = int_to_ptr.hbm [resolvable:$true] %s81_s0 }
   0xe   :  { %59 = dma.hbm_to_vmem [thread:$0]  %s52_s13, 1024, %s54_s17, [#allocation6], %s959_s25, %s959_s25, %s960_s26  }
   0xf   :  { %s96_s3 = sshll.u32 %s1087_s9, 4  ;;  %s964_s22 = smov [#allocation10]   ;;  %s97_s3 = int_to_ptr.hbm [resolvable:$true] %s96_s3 }
  0x10   :  { %s83_s23 = sshll.u32 %s964_s22, 4  ;;  %s965_s24 = smov [#allocation11]   ;;  %s84_s23 = int_to_ptr.vmem [resolvable:$true] %s83_s23 }
  0x11   :  { %89 = dma.hbm_to_vmem [thread:$0]  %s82_s0, 1024, %s84_s23, [#allocation9], %s959_s25, %s959_s25, %s960_s26  }
  0x12   :  { %s98_s7 = sshll.u32 %s965_s24, 4  ;;  %s99_s7 = int_to_ptr.vmem [resolvable:$true] %s98_s7 }
  0x13   :  { %104 = dma.hbm_to_vmem [thread:$0]  %s97_s3, 1024, %s99_s7, [#allocation12], %s959_s25, %s959_s25, %s960_s26  }
  0x14   :  { %948 = dma.done.wait [#allocation3], 64  }
  0x15   :  { %949 = vsyncadd [#allocation3], 4294967232 }
  0x16   :  { %950 = dma.done.wait [#allocation6], 2048  }
  0x17   :  { %951 = vsyncadd [#allocation6], 4294965248 }
  0x18   :  { %952 = dma.done.wait [#allocation9], 2048  }
  0x19   :  { %953 = vsyncadd [#allocation9], 4294965248 }
  0x1a   :  { %954 = dma.done.wait [#allocation12], 1024  }
  0x1b   :  { %955 = vsyncadd [#allocation12], 4294966272  ;;  %v733_v0 = vld [vmem:[#allocation5 + $0x38] sm:$0xff]  ;;  %v732_v1 = vld [vmem:[#allocation5 + $0x30] sm:$0xff]  ;;  %s966_s30 = smov [#allocation13]   ;;  %s553_s14 = sshll.u32 %s1089_s11, 4  ;;  %s554_s14 = int_to_ptr.hbm [resolvable:$true] %s553_s14 }
  0x1c   :  { %200 = vmatpush.bf16.msra.mxu0 %v733_v0  ;;  %v741_v2 = vld [vmem:[#allocation7 + $0x38] sm:$0xff]  ;;  %v731_v3 = vld [vmem:[#allocation5 + $0x28] sm:$0xff]  ;;  %v740_v4 = vld [vmem:[#allocation7 + $0x30] sm:$0xff]  ;;  %s551_s5 = sshll.u32 %s966_s30, 4  ;;  %s552_s5 = int_to_ptr.vmem [resolvable:$true] %s551_s5 }
  0x1d   :  { %283 = vmatpush.bf16.msra.mxu1 %v741_v2  ;;  %v739_v5 = vld [vmem:[#allocation7 + $0x28] sm:$0xff]  ;;  %v730_v6 = vld [vmem:[#allocation5 + $0x20] sm:$0xff]  ;;  %v729_v8 = vld [vmem:[#allocation5 + $0x18] sm:$0xff] }
  0x1e   :  { %v738_v7 = vld [vmem:[#allocation7 + $0x20] sm:$0xff]  ;;  %v737_v9 = vld [vmem:[#allocation7 + $0x18] sm:$0xff]  ;;  %v728_v10 = vld [vmem:[#allocation5 + $0x10] sm:$0xff] }
  0x1f   :  { %v736_v11 = vld [vmem:[#allocation7 + $0x10] sm:$0xff]  ;;  %v727_v12 = vld [vmem:[#allocation5 + $0x8] sm:$0xff]  ;;  %v726_v13 = vld [vmem:[#allocation5] sm:$0xff] }
  0x20   :  { %201 = vmatpush.bf16.msra.mxu0 %v732_v1  ;;  %v131_v14 = vld [vmem:[#allocation2] sm:$0xf]  ;;  %v735_v15 = vld [vmem:[#allocation7 + $0x8] sm:$0xff]  ;;  %v734_v16 = vld [vmem:[#allocation7] sm:$0xff] }
  0x21   :  { %284 = vmatpush.bf16.msra.mxu1 %v740_v4  ;;  %v749_v17 = vld [vmem:[#allocation8 + $0x38] sm:$0xff]  ;;  %v748_v18 = vld [vmem:[#allocation8 + $0x30] sm:$0xff]  ;;  %v747_v19 = vld [vmem:[#allocation8 + $0x28] sm:$0xff] }
  0x22   :  { %366 = vmatpush.bf16.msra.mxu2 %v749_v17  ;;  %v746_v20 = vld [vmem:[#allocation8 + $0x20] sm:$0xff]  ;;  %v745_v21 = vld [vmem:[#allocation8 + $0x18] sm:$0xff]  ;;  %v744_v22 = vld [vmem:[#allocation8 + $0x10] sm:$0xff] }
  0x23   :  { %v775_v23 = vld [vmem:[%s1080_s2] ss:$0 sm:$0xff]  ;;  %v743_v29 = vld [vmem:[#allocation8 + $0x8] sm:$0xff]  ;;  %v742_v30 = vld [vmem:[#allocation8] sm:$0xff] }
  0x24   :  { %202 = vmatpush.bf16.msra.mxu0 %v731_v3  ;;  %v757_v31 = vld [vmem:[#allocation10 + $0x38] sm:$0xff]  ;;  %v756_v32 = vld [vmem:[#allocation10 + $0x30] sm:$0xff]  ;;  %v755_v33 = vld [vmem:[#allocation10 + $0x28] sm:$0xff] }
  0x25   :  { %285 = vmatpush.bf16.msra.mxu1 %v739_v5  ;;  %449 = vmatpush.bf16.msra.mxu3 %v757_v31  ;;  %v754_v34 = vld [vmem:[#allocation10 + $0x20] sm:$0xff]  ;;  %v753_v35 = vld [vmem:[#allocation10 + $0x18] sm:$0xff]  ;;  %v752_v36 = vld [vmem:[#allocation10 + $0x10] sm:$0xff] }
  0x26   :  { %367 = vmatpush.bf16.msra.mxu2 %v748_v18  ;;  %v776_v37 = vld [vmem:[%s1082_s4] ss:$0 sm:$0xff]  ;;  %v751_v43 = vld [vmem:[#allocation10 + $0x8] sm:$0xff]  ;;  %v750_v44 = vld [vmem:[#allocation10] sm:$0xff] }
  0x27   :  { %v765_v45 = vld [vmem:[#allocation11 + $0x38] sm:$0xff]  ;;  %v764_v46 = vld [vmem:[#allocation11 + $0x30] sm:$0xff]  ;;  %v763_v47 = vld [vmem:[#allocation11 + $0x28] sm:$0xff] }
  0x28   :  { %203 = vmatpush.bf16.msra.mxu0 %v730_v6  ;;  %v762_v48 = vld [vmem:[#allocation11 + $0x20] sm:$0xff]  ;;  %v761_v49 = vld [vmem:[#allocation11 + $0x18] sm:$0xff]  ;;  %v760_v50 = vld [vmem:[#allocation11 + $0x10] sm:$0xff] }
  0x29   :  { %286 = vmatpush.bf16.msra.mxu1 %v738_v7  ;;  %450 = vmatpush.bf16.msra.mxu3 %v756_v32  ;;  %v777_v51 = vld [vmem:[%s1084_s6] ss:$0 sm:$0xff]  ;;  %v759_v57 = vld [vmem:[#allocation11 + $0x8] sm:$0xff]  ;;  %v758_v58 = vld [vmem:[#allocation11] sm:$0xff] }
  0x2a   :  { %368 = vmatpush.bf16.msra.mxu2 %v747_v19  ;;  %v778_v59 = vld [vmem:[%s1086_s8] ss:$0 sm:$0xff] }
  0x2b   :  { %v779_v1 = vld [vmem:[%s1088_s10] ss:$0 sm:$0xff] }
  0x2c   :  { %204 = vmatpush.bf16.msra.mxu0 %v729_v8 }
  0x2d   :  { %287 = vmatpush.bf16.msra.mxu1 %v737_v9  ;;  %451 = vmatpush.bf16.msra.mxu3 %v755_v33 }
  0x2e   :  { %369 = vmatpush.bf16.msra.mxu2 %v746_v20 }
  0x30   :  { %205 = vmatpush.bf16.msra.mxu0 %v728_v10 }
  0x31   :  { %288 = vmatpush.bf16.msra.mxu1 %v736_v11  ;;  %452 = vmatpush.bf16.msra.mxu3 %v754_v34 }
  0x32   :  { %370 = vmatpush.bf16.msra.mxu2 %v745_v21 }
  0x34   :  { %206 = vmatpush.bf16.msra.mxu0 %v727_v12 }
  0x35   :  { %289 = vmatpush.bf16.msra.mxu1 %v735_v15  ;;  %453 = vmatpush.bf16.msra.mxu3 %v753_v35 }
  0x36   :  { %371 = vmatpush.bf16.msra.mxu2 %v744_v22 }
  0x38   :  { %207 = vmatpush.bf16.msra.mxu0 %v726_v13 }
  0x39   :  { %290 = vmatpush.bf16.msra.mxu1 %v734_v16  ;;  %454 = vmatpush.bf16.msra.mxu3 %v752_v36 }
  0x3a   :  { %372 = vmatpush.bf16.msra.mxu2 %v743_v29 }
  0x3b   :  { %208 = vmatmul.bf16.vlgmr.msra.gmra.mxu0 %v131_v14 }
  0x3c   :  { %532 = vmatpush.bf16.msrb.mxu0 %v765_v45 }
  0x3d   :  { %455 = vmatpush.bf16.msra.mxu3 %v751_v43 }
  0x3e   :  { %373 = vmatpush.bf16.msra.mxu2 %v742_v30 }
  0x40   :  { %533 = vmatpush.bf16.msrb.mxu0 %v764_v46 }
  0x41   :  { %456 = vmatpush.bf16.msra.mxu3 %v750_v44 }
  0x44   :  { %534 = vmatpush.bf16.msrb.mxu0 %v763_v47 }
  0x48   :  { %535 = vmatpush.bf16.msrb.mxu0 %v762_v48 }
  0x4c   :  { %536 = vmatpush.bf16.msrb.mxu0 %v761_v49 }
  0x50   :  { %537 = vmatpush.bf16.msrb.mxu0 %v760_v50 }
  0x54   :  { %538 = vmatpush.bf16.msrb.mxu0 %v759_v57 }
  0x58   :  { %539 = vmatpush.bf16.msrb.mxu0 %v758_v58 }
  0xb8   :  { %v209_v24 = vpop.f32.mrf.mxu0 }
  0xb9   :  { %v210_v25 = vadd.f32 %v775_v23, %v209_v24 }
  0xbb   :  { %v213_v26 = vmax.f32 %v210_v25, 0.0 }
  0xbd   :  { %v214_v27 = vpack.c.bf16 %v213_v26, %v213_v26 }
  0xbf   :  { %291 = vmatmul.bf16.vlgmr.msra.gmra.mxu1 %v214_v27 }
  0xc0   :  { %v211_v28 = vpop.f32.mrf.mxu0 }
 0x13c   :  { %v292_v38 = vpop.f32.mrf.mxu1 }
 0x13d   :  { %v293_v39 = vadd.f32 %v776_v37, %v292_v38 }
 0x13f   :  { %v296_v40 = vmax.f32 %v293_v39, 0.0 }
 0x141   :  { %v297_v41 = vpack.c.bf16 %v296_v40, %v296_v40 }
 0x143   :  { %374 = vmatmul.bf16.vlgmr.msra.gmra.mxu2 %v297_v41 }
 0x144   :  { %v294_v42 = vpop.f32.mrf.mxu1 }
 0x1c6   :  { %v375_v52 = vpop.f32.mrf.mxu2 }
 0x1c7   :  { %v376_v53 = vadd.f32 %v777_v51, %v375_v52 }
 0x1c9   :  { %v379_v54 = vmax.f32 %v376_v53, 0.0 }
 0x1cb   :  { %v380_v55 = vpack.c.bf16 %v379_v54, %v379_v54 }
 0x1cd   :  { %457 = vmatmul.bf16.vlgmr.msra.gmra.mxu3 %v380_v55 }
 0x1ce   :  { %v377_v56 = vpop.f32.mrf.mxu2 }
 0x250   :  { %v458_v60 = vpop.f32.mrf.mxu3 }
 0x251   :  { %v459_v61 = vadd.f32 %v778_v59, %v458_v60 }
 0x253   :  { %v462_v62 = vmax.f32 %v459_v61, 0.0 }
 0x255   :  { %v463_v63 = vpack.c.bf16 %v462_v62, %v462_v62 }
 0x257   :  { %540 = vmatmul.bf16.vlgmr.msrb.gmra.mxu0 %v463_v63 }
 0x258   :  { %v460_v0 = vpop.f32.mrf.mxu3 }
 0x2d4   :  { %v541_v2 = vpop.f32.mrf.mxu0 }
 0x2d5   :  { %v542_v3 = vadd.f32 %v779_v1, %v541_v2 }
 0x2d7   :  { %545 = vst [vmem:[#allocation13] sm:$0xff] %v542_v3 }
 0x2d8   :  { %556 = dma.vmem_to_hbm [thread:$0]  %s552_s5, 128, %s554_s14, [#allocation4]  }
 0x2dc   :  { %v543_v4 = vpop.f32.mrf.mxu0 }
 0x2dd   :  { %956 = dma.done.wait [#allocation4], 128  }
 0x2de   :  { %957 = vsyncadd [#allocation4], 4294967168 }
 0x2df   :  { %561 = vsyncpa [#allocation3], 1 }
 0x2e0   :  { %562 = vsyncpa [#allocation6], 1 }
 0x2e1   :  { %563 = vsyncpa [#allocation9], 1 }
 0x2e2   :  { %564 = vsyncpa [#allocation12], 1 }
 0x2e3   :  { %565 = vsyncpa [#allocation4], 1 }

</bundles_post_ra>
